<compile_context>
chip_gen: v7x
topology: tpu7x:2x2x1
jax: 0.10.0
libtpu: 0.0.40
codegen_flags: <defaults>
</compile_context>

<pallas_src>
import functools
import math

import jax
import jax.numpy as jnp
from jax.experimental import pallas as pl
from jax.experimental.pallas import tpu as pltpu


# ----------------------------------------------------------------------------
# helpers: hardware query, tile caps, rounding
# ----------------------------------------------------------------------------

def _round_up(x, m):
    return -(-x // m) * m


_VMEM_CAP = None


def _vmem_capacity():
    global _VMEM_CAP
    if _VMEM_CAP is None:
        try:
            _VMEM_CAP = int(pltpu.get_tpu_info().vmem_capacity_bytes)
        except Exception:
            _VMEM_CAP = 64 << 20            # conservative (v7x-sized) fallback
    return _VMEM_CAP


def _tile_caps():
    """Generation-aware tile caps.

    v5e / v6e (128 MiB VMEM): large tiles -> fewer grid steps / B re-reads.
    v7x (64 MiB VMEM, 2 TCs/chip): smaller tiles to stay inside scoped VMEM.
    """
    if _vmem_capacity() >= (100 << 20):
        return {"tm": 1024, "tn": 1024, "tk": 1024, "tew": 1024}
    return {"tm": 512, "tn": 512, "tk": 1024, "tew": 512}


def _vmem_limit_bytes():
    cap = _vmem_capacity()
    return int(min(max(cap - (16 << 20), 32 << 20), 100 << 20))


def _cparams(dims):
    return pltpu.CompilerParams(dimension_semantics=dims,
                                vmem_limit_bytes=_vmem_limit_bytes())


# ----------------------------------------------------------------------------
# Grouped matmul kernel: bf16 MXU, f32 resident accumulation, fused
# bias / accumulator-init / per-group BN-stats epilogue.
# ----------------------------------------------------------------------------

def _make_mm_kernel(has_bias, has_init, want_stats):
    def kernel(*refs):
        it = iter(refs)
        a_ref = next(it)                       # (tm, tk) bf16
        b_ref = next(it)                       # (tk, tn) bf16
        bias_ref = next(it) if has_bias else None   # (1, tn) f32
        init_ref = next(it) if has_init else None   # (tm, tn) f32
        o_ref = next(it)                       # (tm, tn) f32 (resident over k)
        s_ref = next(it) if want_stats else None    # (8, tn) f32
        q_ref = next(it) if want_stats else None    # (8, tn) f32

        k = pl.program_id(3)

        @pl.when(k == 0)
        def _():
            if has_init:
                o_ref[...] = init_ref[...]
            else:
                o_ref[...] = jnp.zeros_like(o_ref)

        o_ref[...] += jnp.dot(a_ref[...], b_ref[...],
                              preferred_element_type=jnp.float32)

        @pl.when(k == pl.num_programs(3) - 1)
        def _():
            if want_stats:
                # Pre-bias column stats: zero-padded rows contribute nothing,
                # and variance is invariant to the bias shift.
                acc = o_ref[...]
                cs = jnp.sum(acc, axis=0, keepdims=True)
                cq = jnp.sum(acc * acc, axis=0, keepdims=True)
                zpad = jnp.zeros((7, acc.shape[1]), jnp.float32)
                s_ref[...] = jnp.concatenate([cs, zpad], axis=0)
                q_ref[...] = jnp.concatenate([cq, zpad], axis=0)
            if has_bias:
                o_ref[...] += bias_ref[...]
    return kernel


@functools.partial(jax.jit, static_argnames=("has_bias", "has_init",
                                              "want_stats"))
def _grouped_matmul(a, b, bias, init, *, has_bias, has_init, want_stats):
    """a: (G, M, K), b: (K, N).  Returns (G, M, N) f32 [, s (G,N), q (G,N)]."""
    G, M, K = a.shape
    N = b.shape[1]
    caps = _tile_caps()
    tm = min(caps["tm"], _round_up(M, 16))
    n_align = 256 if N > 128 else 128           # 256-wide MXU on v6e/v7x
    k_align = 256 if K > 128 else 128
    tn = min(caps["tn"], _round_up(N, n_align))
    tk = min(caps["tk"], _round_up(K, k_align))
    Mp, Kp, Np = _round_up(M, tm), _round_up(K, tk), _round_up(N, tn)

    a_p = a.astype(jnp.bfloat16)
    if (Mp, Kp) != (M, K):
        a_p = jnp.pad(a_p, ((0, 0), (0, Mp - M), (0, Kp - K)))
    b_p = b.astype(jnp.bfloat16)
    if (Kp, Np) != (K, N):
        b_p = jnp.pad(b_p, ((0, Kp - K), (0, Np - N)))

    operands = [a_p, b_p]
    in_specs = [pl.BlockSpec((None, tm, tk), lambda g, i, j, k: (g, i, k)),
                pl.BlockSpec((tk, tn), lambda g, i, j, k: (k, j))]
    if has_bias:
        bias_p = bias.astype(jnp.float32).reshape(1, N)
        if Np != N:
            bias_p = jnp.pad(bias_p, ((0, 0), (0, Np - N)))
        operands.append(bias_p)
        in_specs.append(pl.BlockSpec((1, tn), lambda g, i, j, k: (0, j)))
    if has_init:
        init_p = init.astype(jnp.float32)
        if (Mp, Np) != (M, N):
            init_p = jnp.pad(init_p, ((0, 0), (0, Mp - M), (0, Np - N)))
        operands.append(init_p)
        in_specs.append(pl.BlockSpec((None, tm, tn),
                                     lambda g, i, j, k: (g, i, j)))

    out_shape = [jax.ShapeDtypeStruct((G, Mp, Np), jnp.float32)]
    out_specs = [pl.BlockSpec((None, tm, tn), lambda g, i, j, k: (g, i, j))]
    if want_stats:
        n_i = Mp // tm
        out_shape += [jax.ShapeDtypeStruct((G, 8 * n_i, Np), jnp.float32)] * 2
        out_specs += [pl.BlockSpec((None, 8, tn),
                                   lambda g, i, j, k: (g, i, j))] * 2

    outs = pl.pallas_call(
        _make_mm_kernel(has_bias, has_init, want_stats),
        out_shape=tuple(out_shape) if len(out_shape) > 1 else out_shape[0],
        grid=(G, Mp // tm, Np // tn, Kp // tk),
        in_specs=in_specs,
        out_specs=tuple(out_specs) if len(out_specs) > 1 else out_specs[0],
        compiler_params=_cparams(("parallel", "parallel", "parallel",
                                  "arbitrary")),
    )(*operands)

    if want_stats:
        o, s, q = outs
    else:
        o = outs
    if (Mp, Np) != (M, N):
        o = o[:, :M, :N]
    if not want_stats:
        return o
    s = s[:, :, :N].sum(axis=1)
    q = q[:, :, :N].sum(axis=1)
    return o, s, q


# ----------------------------------------------------------------------------
# BatchNorm-apply (+ReLU, bf16 out) and fused LSTM gate kernels
# ----------------------------------------------------------------------------

def _bn_apply_kernel(x_ref, sc_ref, sh_ref, o_ref, *, relu):
    y = x_ref[...] * sc_ref[...] + sh_ref[...]
    if relu:
        y = jnp.maximum(y, 0.0)
    o_ref[...] = y.astype(o_ref.dtype)


@functools.partial(jax.jit, static_argnames=("relu",))
def pallas_bn_apply(x, scale, shift, relu):
    """x: (G, M, C) f32, scale/shift: (G, C) -> (G, M, C) bf16."""
    G, M, C = x.shape
    tm = min(_tile_caps()["tew"], _round_up(M, 16))
    Mp = _round_up(M, tm)
    xp = x if Mp == M else jnp.pad(x, ((0, 0), (0, Mp - M), (0, 0)))
    sc = scale.reshape(G, 1, C)
    sh = shift.reshape(G, 1, C)
    out = pl.pallas_call(
        functools.partial(_bn_apply_kernel, relu=relu),
        out_shape=jax.ShapeDtypeStruct((G, Mp, C), jnp.bfloat16),
        grid=(G, Mp // tm),
        in_specs=[pl.BlockSpec((None, tm, C), lambda g, i: (g, i, 0)),
                  pl.BlockSpec((None, 1, C), lambda g, i: (g, 0, 0)),
                  pl.BlockSpec((None, 1, C), lambda g, i: (g, 0, 0))],
        out_specs=pl.BlockSpec((None, tm, C), lambda g, i: (g, i, 0)),
        compiler_params=_cparams(("parallel", "parallel")),
    )(xp, sc, sh)
    return out if Mp == M else out[:, :M]


def _lstm_gate_kernel(g_ref, c_ref, h_ref, cn_ref):
    # Gate chunk order matches the reference ConvLSTMCell:
    # (in_gate, remember_gate, out_gate, cell_gate) along channels.
    hd = c_ref.shape[-1]
    g = g_ref[...]
    in_g = jax.nn.sigmoid(g[:, 0:hd])
    rem_g = jax.nn.sigmoid(g[:, hd:2 * hd])
    out_g = jax.nn.sigmoid(g[:, 2 * hd:3 * hd])
    cell_g = jnp.tanh(g[:, 3 * hd:4 * hd])
    c_new = rem_g * c_ref[...] + in_g * cell_g
    cn_ref[...] = c_new
    h_ref[...] = (out_g * jnp.tanh(c_new)).astype(h_ref.dtype)


@jax.jit
def pallas_lstm_gates(gates, prev_cell):
    """gates: (M, 4H) f32 pre-activation, prev_cell: (M, H) f32."""
    M, H4 = gates.shape
    hd = H4 // 4
    tm = min(_tile_caps()["tew"], _round_up(M, 16))
    Mp = _round_up(M, tm)
    gp = gates if Mp == M else jnp.pad(gates, ((0, Mp - M), (0, 0)))
    cp = prev_cell if Mp == M else jnp.pad(prev_cell, ((0, Mp - M), (0, 0)))
    h, c = pl.pallas_call(
        _lstm_gate_kernel,
        out_shape=(jax.ShapeDtypeStruct((Mp, hd), jnp.bfloat16),
                   jax.ShapeDtypeStruct((Mp, hd), jnp.float32)),
        grid=(Mp // tm,),
        in_specs=[pl.BlockSpec((tm, H4), lambda i: (i, 0)),
                  pl.BlockSpec((tm, hd), lambda i: (i, 0))],
        out_specs=(pl.BlockSpec((tm, hd), lambda i: (i, 0)),
                   pl.BlockSpec((tm, hd), lambda i: (i, 0))),
        compiler_params=_cparams(("parallel",)),
    )(gp, cp)
    if Mp != M:
        h, c = h[:M], c[:M]
    return h, c


# ----------------------------------------------------------------------------
# Conv / ConvTranspose built on the grouped Pallas matmul (im2col glue in JAX)
# ----------------------------------------------------------------------------

def _im2col(x, kh, kw, stride, padding):
    n, h, w, c = x.shape
    if padding > 0:
        x = jnp.pad(x, ((0, 0), (padding, padding), (padding, padding), (0, 0)))
    hp, wp = x.shape[1], x.shape[2]
    ho = (hp - kh) // stride + 1
    wo = (wp - kw) // stride + 1
    cols = []
    for i in range(kh):
        for j in range(kw):
            cols.append(x[:, i:i + stride * ho:stride,
                          j:j + stride * wo:stride, :])
    patches = jnp.concatenate(cols, axis=-1)          # (n, ho, wo, kh*kw*c)
    return patches, ho, wo


@functools.partial(jax.jit, static_argnames=("stride", "padding", "groups",
                                              "want_stats"))
def conv2d(x, w, b, init=None, *, stride=1, padding=0, groups=1,
           want_stats=False):
    """x: (B,H,W,Cin) NHWC, w: (kh,kw,Cin,Cout), b: (Cout,) or None.
    `init` (optional, (B,Ho,Wo,Cout)) initializes the accumulator (fused add).
    """
    kh, kw, cin, cout = w.shape
    patches, ho, wo = _im2col(x.astype(jnp.bfloat16), kh, kw, stride, padding)
    bsz = x.shape[0]
    mb = (bsz // groups) * ho * wo
    a = patches.reshape(groups, mb, kh * kw * cin)
    w2 = w.reshape(kh * kw * cin, cout)
    init_r = None if init is None else init.reshape(groups, mb, cout)
    res = _grouped_matmul(a, w2, b, init_r,
                          has_bias=b is not None,
                          has_init=init is not None,
                          want_stats=want_stats)
    if want_stats:
        o, s, q = res
        return o.reshape(bsz, ho, wo, cout), s, q
    return res.reshape(bsz, ho, wo, cout)


@functools.partial(jax.jit, static_argnames=("stride", "padding", "groups",
                                              "want_stats"))
def conv_transpose2d(x, w_eq, b, *, stride, padding, groups=1,
                     want_stats=False):
    """ConvTranspose2d with weights in conv-equivalent layout (kh,kw,Cin,Cout).
    stride-2 / k4 / p1 uses the 4-phase sub-pixel decomposition."""
    kh = w_eq.shape[0]
    if stride == 1:
        return conv2d(x, w_eq, b, stride=1, padding=kh - 1 - padding,
                      groups=groups, want_stats=want_stats)

    assert stride == 2 and kh == 4 and padding == 1
    bsz, h, w, _ = x.shape
    cout = w_eq.shape[3]
    xp = jnp.pad(x.astype(jnp.bfloat16), ((0, 0), (1, 1), (1, 1), (0, 0)))
    s_tot = q_tot = None
    rows = []
    for py in range(2):
        cols = []
        for px in range(2):
            w_ph = w_eq[py::2, px::2]                         # (2,2,Cin,Cout)
            x_ph = xp[:, py:py + h + 1, px:px + w + 1, :]
            res = conv2d(x_ph, w_ph, b, stride=1, padding=0, groups=groups,
                         want_stats=want_stats)
            if want_stats:
                y_ph, s, q = res
                s_tot = s if s_tot is None else s_tot + s
                q_tot = q if q_tot is None else q_tot + q
            else:
                y_ph = res
            cols.append(y_ph)
        rows.append(jnp.stack(cols, axis=3))                  # (B,h,w,2,C)
    y = jnp.stack(rows, axis=2)                               # (B,h,2,w,2,C)
    y = y.reshape(bsz, 2 * h, 2 * w, cout)
    if want_stats:
        return y, s_tot, q_tot
    return y


@functools.partial(jax.jit, static_argnames=("groups", "relu"))
def batchnorm_apply(y, s, q, conv_bias, bn, *, groups, relu=True):
    """Training-mode BatchNorm using fused pre-bias statistics (per group)."""
    B, H, W, C = y.shape
    rows = (B // groups) * H * W
    mean = s / rows + conv_bias[None, :]                      # post-bias mean
    var = jnp.maximum(q / rows - (s / rows) ** 2, 0.0)        # shift-invariant
    scale = bn["gamma"][None, :] * jax.lax.rsqrt(var + 1e-5)
    shift = bn["beta"][None, :] - mean * scale
    out = pallas_bn_apply(y.reshape(groups, rows, C), scale, shift, relu)
    return out.reshape(B, H, W, C)


# ----------------------------------------------------------------------------
# Parameter construction (deterministic, synthetic — mirrors module __init__)
# ----------------------------------------------------------------------------

class _KeyGen:
    def __init__(self, key):
        self._key = key

    def __call__(self):
        self._key, sub = jax.random.split(self._key)
        return sub


def _conv_param(kg, k, cin, cout):
    fan_in = k * k * cin
    bound = 1.0 / math.sqrt(fan_in)
    return {"w": jax.random.uniform(kg(), (k, k, cin, cout), jnp.float32,
                                    -bound, bound),
            "b": jax.random.uniform(kg(), (cout,), jnp.float32, -bound, bound)}


def _bn_param(c):
    return {"gamma": jnp.ones((c,), jnp.float32),
            "beta": jnp.zeros((c,), jnp.float32)}


def init_params(key, *, feature_num=6, z_dim=100, in_channel=128,
                RNN_hidden=(512,), final_tanh=0,
                feat_ch=(256, 512), cb1_ch=(2048, 1024, 1024, 512),
                cb2_ch=(256, 128)):
    kg = _KeyGen(key)
    p = {"RNN_hidden": tuple(RNN_hidden), "final_tanh": final_tanh}

    p["feat"] = [_conv_param(kg, 4, in_channel, feat_ch[0]), _bn_param(feat_ch[0]),
                 _conv_param(kg, 3, feat_ch[0], feat_ch[1]), _bn_param(feat_ch[1])]

    zc = z_dim + feature_num
    p["cb1"] = [_conv_param(kg, 4, zc, cb1_ch[0]), _bn_param(cb1_ch[0]),
                _conv_param(kg, 4, cb1_ch[0], cb1_ch[1]), _bn_param(cb1_ch[1]),
                _conv_param(kg, 4, cb1_ch[1], cb1_ch[2]), _bn_param(cb1_ch[2]),
                _conv_param(kg, 4, cb1_ch[2], cb1_ch[3]), _bn_param(cb1_ch[3])]

    p["cb2"] = [_conv_param(kg, 4, RNN_hidden[-1], cb2_ch[0]), _bn_param(cb2_ch[0]),
                _conv_param(kg, 3, cb2_ch[0], cb2_ch[1])]

    p["lstm"] = []
    input_dim = cb1_ch[3] + feat_ch[1]
    for hd in RNN_hidden:
        p["lstm"].append({"hidden": hd,
                          "gates": _conv_param(kg, 3, input_dim + hd, 4 * hd)})
        input_dim = hd
    return p


# ----------------------------------------------------------------------------
# Forward passes (NHWC internally, branch-batched with per-branch BN groups)
# ----------------------------------------------------------------------------

def conv_blocks_feature_fwd(p, x, groups):
    y, s, q = conv2d(x, p[0]["w"], p[0]["b"], stride=2, padding=1,
                     groups=groups, want_stats=True)
    x = batchnorm_apply(y, s, q, p[0]["b"], p[1], groups=groups, relu=True)
    y, s, q = conv2d(x, p[2]["w"], p[2]["b"], stride=1, padding=1,
                     groups=groups, want_stats=True)
    x = batchnorm_apply(y, s, q, p[2]["b"], p[3], groups=groups, relu=True)
    return x


def conv_blocks1_fwd(p, z, groups):
    y, s, q = conv_transpose2d(z, p[0]["w"], p[0]["b"], stride=1, padding=0,
                               groups=groups, want_stats=True)
    x = batchnorm_apply(y, s, q, p[0]["b"], p[1], groups=groups, relu=True)
    for li in (1, 2, 3):
        y, s, q = conv_transpose2d(x, p[2 * li]["w"], p[2 * li]["b"],
                                   stride=2, padding=1, groups=groups,
                                   want_stats=True)
        x = batchnorm_apply(y, s, q, p[2 * li]["b"], p[2 * li + 1],
                            groups=groups, relu=True)
    return x


def conv_blocks2_fwd(p, x, groups):
    y, s, q = conv_transpose2d(x, p[0]["w"], p[0]["b"], stride=2, padding=1,
                               groups=groups, want_stats=True)
    x = batchnorm_apply(y, s, q, p[0]["b"], p[1], groups=groups, relu=True)
    x = conv_transpose2d(x, p[2]["w"], p[2]["b"], stride=1, padding=1)
    return x


def lstm_precompute_gx(p, x):
    """W_x part of the gate conv (+bias); reused across all timesteps."""
    cin = x.shape[-1]
    wx = p["gates"]["w"][:, :, :cin, :]
    return conv2d(x, wx, p["gates"]["b"], stride=1, padding=1)


def conv_lstm_cell_step(p, gx, x_cin, prev_state):
    """One ConvLSTM step given the precomputed W_x*x + bias (gx)."""
    n, h, w, _ = gx.shape
    hd = p["hidden"]
    if prev_state is None:
        gates = gx                         # W_h contribution is zero
        prev_c = jnp.zeros((n, h, w, hd), jnp.float32)
    else:
        prev_h, prev_c = prev_state
        wh = p["gates"]["w"][:, :, x_cin:, :]
        # gx fused as accumulator init of the W_h matmul (no standalone add).
        gates = conv2d(prev_h, wh, None, gx, stride=1, padding=1)
    m = n * h * w
    h_f, c_f = pallas_lstm_gates(gates.reshape(m, 4 * hd),
                                 prev_c.reshape(m, hd))
    # Dropout(dp=0) is the identity.
    return (h_f.reshape(n, h, w, hd), c_f.reshape(n, h, w, hd))


def conv_lstm_cell_fwd(p, x, prev_state):
    """Generic ConvLSTM step (used for the 2nd stacked cell)."""
    n, h, w, cin = x.shape
    hd = p["hidden"]
    if prev_state is None:
        prev_h = jnp.zeros((n, h, w, hd), jnp.bfloat16)
        prev_c = jnp.zeros((n, h, w, hd), jnp.float32)
    else:
        prev_h, prev_c = prev_state
    stacked = jnp.concatenate([x.astype(jnp.bfloat16),
                               prev_h.astype(jnp.bfloat16)], axis=-1)
    gates = conv2d(stacked, p["gates"]["w"], p["gates"]["b"],
                   stride=1, padding=1)
    m = n * h * w
    h_f, c_f = pallas_lstm_gates(gates.reshape(m, 4 * hd),
                                 prev_c.reshape(m, hd))
    return (h_f.reshape(n, h, w, hd), c_f.reshape(n, h, w, hd))


def generator_forward(params, z, feature1, att_1, grad_1, feature2, att_2,
                      grad_2, grad_3, index, feature3, att_3, grad_4,
                      return_all=0):
    """Inputs/outputs are NCHW (PyTorch convention).  `index` is unused
    (as in the reference forward)."""
    del index
    _tile_caps()  # prime the hardware-info cache outside any trace
    to_nhwc = lambda t: jnp.transpose(t, (0, 2, 3, 1))
    to_nchw = lambda t: jnp.transpose(t, (0, 3, 1, 2))
    n = z.shape[0]

    # Batch the 3 identical branches; BN stats stay per-branch via groups=3.
    z_all = jnp.concatenate(
        [jnp.concatenate([z, a.reshape(n, -1, 1, 1)], axis=1)
         for a in (att_1, att_2, att_3)], axis=0)
    f_all = jnp.concatenate([feature1, feature2, feature3], axis=0)

    mid_z = conv_blocks1_fwd(params["cb1"], to_nhwc(z_all), groups=3)
    mid_f = conv_blocks_feature_fwd(params["feat"], to_nhwc(f_all), groups=3)
    x_all = jnp.concatenate([mid_z, mid_f], axis=-1)        # (3n, h, w, Cin_x)
    x_cin = x_all.shape[-1]

    # W_x gate conv for all 3 branches at once; reused across timesteps.
    gx_all = lstm_precompute_gx(params["lstm"][0], x_all)

    RNN_hidden = params["RNN_hidden"]
    g1, g2, g3, g4 = int(grad_1), int(grad_2), int(grad_3), int(grad_4)

    hidden = None
    hidden_0 = None
    all_hidden = []
    for idx in range(6):
        if g1 <= idx < g2:
            branch = 0
        elif g2 <= idx < g3:
            branch = 1
        elif idx >= g3:
            branch = 2
        else:
            branch = None

        if len(RNN_hidden) == 1:
            if branch is None:
                hidden = None
            else:
                gx_b = gx_all[branch * n:(branch + 1) * n]
                hidden = conv_lstm_cell_step(params["lstm"][0], gx_b, x_cin,
                                             hidden)
        elif len(RNN_hidden) == 2:
            if branch is None:
                hidden = None
                hidden_0 = None
            else:
                gx_b = gx_all[branch * n:(branch + 1) * n]
                hidden_0 = conv_lstm_cell_step(params["lstm"][0], gx_b, x_cin,
                                               hidden_0)
                hidden = conv_lstm_cell_fwd(params["lstm"][1], hidden_0[0],
                                            hidden)
        if idx == g2 - 1 or idx == g3 - 1 or idx == g4 - 1:
            all_hidden.append(hidden)

    if return_all == 1:
        featuremap = [None] * len(all_hidden)
        present = [i for i, hdn in enumerate(all_hidden) if hdn is not None]
        if present:
            # Batch the head over all snapshots; BN stays per-snapshot (groups).
            h_stack = jnp.concatenate([all_hidden[i][0] for i in present],
                                      axis=0)
            fm_all = conv_blocks2_fwd(params["cb2"], h_stack,
                                      groups=len(present))
            fm_all = to_nchw(fm_all)
            for pos, i in enumerate(present):
                featuremap[i] = fm_all[pos * n:(pos + 1) * n]
        return featuremap
    else:
        fm = to_nchw(conv_blocks2_fwd(params["cb2"], hidden[0], groups=1))
        if params.get("final_tanh", 0):
            fm = jnp.tanh(fm)
        return fm


# ----------------------------------------------------------------------------
# Main
# ----------------------------------------------------------------------------

if __name__ == "__main__":
    key = jax.random.PRNGKey(0)
    pkey, dz, df1, df2, df3, da1, da2, da3 = jax.random.split(key, 8)

    # Small, architecture-consistent configuration (scaled-down channel widths;
    # spatial sizes are forced by the module's conv/deconv strides):
    #   z:(N, z_dim, 1, 1) -> conv_blocks1 -> (N, 32, 32, 32)  [NHWC]
    #   feature:(N, in_channel, 64, 64) -> conv_blocks_feature -> (N, 32, 32, 32)
    #   LSTM hidden 16 @ 32x32; head output 8 channels @ 64x64.
    N = 1
    feature_num = 4
    z_dim = 12
    in_channel = 8
    RNN_hidden = (16,)
    out_channels = 8

    params = init_params(
        pkey, feature_num=feature_num, z_dim=z_dim, in_channel=in_channel,
        RNN_hidden=RNN_hidden, final_tanh=0,
        feat_ch=(16, 32), cb1_ch=(64, 48, 48, 32), cb2_ch=(16, out_channels))

    z = jax.random.normal(dz, (N, z_dim, 1, 1), jnp.float32)
    feature1 = jax.random.normal(df1, (N, in_channel, 64, 64), jnp.float32)
    feature2 = jax.random.normal(df2, (N, in_channel, 64, 64), jnp.float32)
    feature3 = jax.random.normal(df3, (N, in_channel, 64, 64), jnp.float32)
    att_1 = jax.random.normal(da1, (N, feature_num), jnp.float32)
    att_2 = jax.random.normal(da2, (N, feature_num), jnp.float32)
    att_3 = jax.random.normal(da3, (N, feature_num), jnp.float32)

    grad_1, grad_2, grad_3, grad_4 = 1, 3, 4, 6
    index = 0  # unused by the reference forward

    featuremaps = generator_forward(params, z, feature1, att_1, grad_1,
                                    feature2, att_2, grad_2, grad_3, index,
                                    feature3, att_3, grad_4, return_all=1)
    for fm in featuremaps:
        if fm is not None:
            jax.block_until_ready(fm)
            assert fm.shape == (N, out_channels, 64, 64), fm.shape

    # Also exercise the return_all=0 path once.
    fm_single = generator_forward(params, z, feature1, att_1, grad_1,
                                  feature2, att_2, grad_2, grad_3, index,
                                  feature3, att_3, grad_4, return_all=0)
    jax.block_until_ready(fm_single)
    assert fm_single.shape == (N, out_channels, 64, 64), fm_single.shape
    print("KERNEL_OK")
</pallas_src>

<mosaic_0001>
module attributes {stable_mosaic.version = 11 : i64} {
  func.func @kernel(%arg0: i32, %arg1: i32, %arg2: i32, %arg3: i32, %arg4: memref<1x16x256xbf16, #tpu.memory_space<vmem>>, %arg5: memref<256x128xbf16, #tpu.memory_space<vmem>>, %arg6: memref<1x128xf32, #tpu.memory_space<vmem>>, %arg7: memref<1x16x128xf32, #tpu.memory_space<vmem>>, %arg8: memref<1x8x128xf32, #tpu.memory_space<vmem>>, %arg9: memref<1x8x128xf32, #tpu.memory_space<vmem>>) attributes {dimension_semantics = [#tpu.dimension_semantics<parallel>, #tpu.dimension_semantics<parallel>, #tpu.dimension_semantics<parallel>, #tpu.dimension_semantics<arbitrary>], iteration_bounds = array<i64: 3, 1, 1, 1>, scalar_prefetch = 0 : i64, scratch_operands = 0 : i64, tpu.core_type = #tpu.core_type<tc>, window_params = [{transform_indices = @transform_0, window_bounds = array<i64: 1, 16, 256>}, {transform_indices = @transform_1, window_bounds = array<i64: 256, 128>}, {transform_indices = @transform_2, window_bounds = array<i64: 1, 128>}, {transform_indices = @transform_3, window_bounds = array<i64: 1, 16, 128>}, {transform_indices = @transform_4, window_bounds = array<i64: 1, 8, 128>}, {transform_indices = @transform_5, window_bounds = array<i64: 1, 8, 128>}]} {
    %c0_i32 = arith.constant 0 : i32
    %0 = arith.cmpi eq, %arg3, %c0_i32 : i32
    %1 = arith.extui %0 : i1 to i32
    %c0_i32_0 = arith.constant 0 : i32
    %2 = arith.cmpi ne, %1, %c0_i32_0 : i32
    scf.if %2 {
      %cst_13 = arith.constant 0.000000e+00 : f32
      %16 = vector.broadcast %cst_13 : f32 to vector<16x128xf32>
      %c0_14 = arith.constant 0 : index
      %c0_15 = arith.constant 0 : index
      %c0_16 = arith.constant 0 : index
      %17 = vector.load %arg7[%c0_14, %c0_15, %c0_16] : memref<1x16x128xf32, #tpu.memory_space<vmem>>, vector<1x16x128xf32>
      %18 = vector.shape_cast %17 : vector<1x16x128xf32> to vector<16x128xf32>
      %19 = vector.shape_cast %16 : vector<16x128xf32> to vector<1x16x128xf32>
      tpu.vector_store %arg7[%c0_14, %c0_15, %c0_16], %19 {strides = array<i32>} : memref<1x16x128xf32, #tpu.memory_space<vmem>>, vector<1x16x128xf32>,
    } else {
    }
    %c0 = arith.constant 0 : index
    %c0_1 = arith.constant 0 : index
    %c0_2 = arith.constant 0 : index
    %3 = vector.load %arg7[%c0, %c0_1, %c0_2] : memref<1x16x128xf32, #tpu.memory_space<vmem>>, vector<1x16x128xf32>
    %4 = vector.shape_cast %3 : vector<1x16x128xf32> to vector<16x128xf32>
    %c0_3 = arith.constant 0 : index
    %c0_4 = arith.constant 0 : index
    %c0_5 = arith.constant 0 : index
    %5 = vector.load %arg4[%c0_3, %c0_4, %c0_5] : memref<1x16x256xbf16, #tpu.memory_space<vmem>>, vector<1x16x256xbf16>
    %6 = vector.shape_cast %5 : vector<1x16x256xbf16> to vector<16x256xbf16>
    %c0_6 = arith.constant 0 : index
    %c0_7 = arith.constant 0 : index
    %7 = vector.load %arg5[%c0_6, %c0_7] : memref<256x128xbf16, #tpu.memory_space<vmem>>, vector<256x128xbf16>
    %cst = arith.constant dense<0.000000e+00> : vector<16x128xf32>
    %8 = tpu.matmul %6, %7, %cst {dimension_numbers = #tpu.dot_dimension_numbers<[1], [0], [0], [1], [0, 0, 1, 1], [], []>} : vector<16x256xbf16>, vector<256x128xbf16>, vector<16x128xf32> -> vector<16x128xf32>
    %9 = arith.addf %4, %8 : vector<16x128xf32>
    %c0_8 = arith.constant 0 : index
    %c0_9 = arith.constant 0 : index
    %c0_10 = arith.constant 0 : index
    %10 = vector.load %arg7[%c0_8, %c0_9, %c0_10] : memref<1x16x128xf32, #tpu.memory_space<vmem>>, vector<1x16x128xf32>
    %11 = vector.shape_cast %10 : vector<1x16x128xf32> to vector<16x128xf32>
    %12 = vector.shape_cast %9 : vector<16x128xf32> to vector<1x16x128xf32>
    tpu.vector_store %arg7[%c0_8, %c0_9, %c0_10], %12 {strides = array<i32>} : memref<1x16x128xf32, #tpu.memory_space<vmem>>, vector<1x16x128xf32>,
    %c0_i32_11 = arith.constant 0 : i32
    %13 = arith.cmpi eq, %arg3, %c0_i32_11 : i32
    %14 = arith.extui %13 : i1 to i32
    %c0_i32_12 = arith.constant 0 : i32
    %15 = arith.cmpi ne, %14, %c0_i32_12 : i32
    scf.if %15 {
      %c0_13 = arith.constant 0 : index
      %c0_14 = arith.constant 0 : index
      %c0_15 = arith.constant 0 : index
      %16 = vector.load %arg7[%c0_13, %c0_14, %c0_15] : memref<1x16x128xf32, #tpu.memory_space<vmem>>, vector<1x16x128xf32>
      %17 = vector.shape_cast %16 : vector<1x16x128xf32> to vector<16x128xf32>
      %cst_16 = arith.constant dense<0.000000e+00> : vector<128xf32>
      %18 = vector.multi_reduction <add>, %17, %cst_16 [0] : vector<16x128xf32> to vector<128xf32>
      %19 = vector.shape_cast %18 : vector<128xf32> to vector<1x128xf32>
      %20 = arith.mulf %17, %17 : vector<16x128xf32>
      %cst_17 = arith.constant dense<0.000000e+00> : vector<128xf32>
      %21 = vector.multi_reduction <add>, %20, %cst_17 [0] : vector<16x128xf32> to vector<128xf32>
      %22 = vector.shape_cast %21 : vector<128xf32> to vector<1x128xf32>
      %cst_18 = arith.constant 0.000000e+00 : f32
      %23 = vector.broadcast %cst_18 : f32 to vector<7x128xf32>
      %24 = tpu.concatenate %19, %23 in 0 : vector<1x128xf32>, vector<7x128xf32> -> vector<8x128xf32>
      %c0_19 = arith.constant 0 : index
      %c0_20 = arith.constant 0 : index
      %c0_21 = arith.constant 0 : index
      %25 = vector.load %arg8[%c0_19, %c0_20, %c0_21] : memref<1x8x128xf32, #tpu.memory_space<vmem>>, vector<1x8x128xf32>
      %26 = vector.shape_cast %25 : vector<1x8x128xf32> to vector<8x128xf32>
      %27 = vector.shape_cast %24 : vector<8x128xf32> to vector<1x8x128xf32>
      tpu.vector_store %arg8[%c0_19, %c0_20, %c0_21], %27 {strides = array<i32>} : memref<1x8x128xf32, #tpu.memory_space<vmem>>, vector<1x8x128xf32>,
      %28 = tpu.concatenate %22, %23 in 0 : vector<1x128xf32>, vector<7x128xf32> -> vector<8x128xf32>
      %c0_22 = arith.constant 0 : index
      %c0_23 = arith.constant 0 : index
      %c0_24 = arith.constant 0 : index
      %29 = vector.load %arg9[%c0_22, %c0_23, %c0_24] : memref<1x8x128xf32, #tpu.memory_space<vmem>>, vector<1x8x128xf32>
      %30 = vector.shape_cast %29 : vector<1x8x128xf32> to vector<8x128xf32>
      %31 = vector.shape_cast %28 : vector<8x128xf32> to vector<1x8x128xf32>
      tpu.vector_store %arg9[%c0_22, %c0_23, %c0_24], %31 {strides = array<i32>} : memref<1x8x128xf32, #tpu.memory_space<vmem>>, vector<1x8x128xf32>,
      %c0_25 = arith.constant 0 : index
      %c0_26 = arith.constant 0 : index
      %c0_27 = arith.constant 0 : index
      %32 = vector.load %arg7[%c0_25, %c0_26, %c0_27] : memref<1x16x128xf32, #tpu.memory_space<vmem>>, vector<1x16x128xf32>
      %33 = vector.shape_cast %32 : vector<1x16x128xf32> to vector<16x128xf32>
      %c0_28 = arith.constant 0 : index
      %c0_29 = arith.constant 0 : index
      %34 = vector.load %arg6[%c0_28, %c0_29] : memref<1x128xf32, #tpu.memory_space<vmem>>, vector<1x128xf32>
      %35 = vector.broadcast %34 : vector<1x128xf32> to vector<16x128xf32>
      %36 = arith.addf %33, %35 : vector<16x128xf32>
      %c0_30 = arith.constant 0 : index
      %c0_31 = arith.constant 0 : index
      %c0_32 = arith.constant 0 : index
      %37 = vector.load %arg7[%c0_30, %c0_31, %c0_32] : memref<1x16x128xf32, #tpu.memory_space<vmem>>, vector<1x16x128xf32>
      %38 = vector.shape_cast %37 : vector<1x16x128xf32> to vector<16x128xf32>
      %39 = vector.shape_cast %36 : vector<16x128xf32> to vector<1x16x128xf32>
      tpu.vector_store %arg7[%c0_30, %c0_31, %c0_32], %39 {strides = array<i32>} : memref<1x16x128xf32, #tpu.memory_space<vmem>>, vector<1x16x128xf32>,
    } else {
    }
    return
  }
  func.func @transform_0(%arg0: i32, %arg1: i32, %arg2: i32, %arg3: i32) -> (i32, i32, i32) {
    %c0_i32 = arith.constant 0 : i32
    return %arg0, %arg1, %arg3 : i32, i32, i32
  }
  func.func @transform_1(%arg0: i32, %arg1: i32, %arg2: i32, %arg3: i32) -> (i32, i32) {
    %c0_i32 = arith.constant 0 : i32
    return %arg3, %arg2 : i32, i32
  }
  func.func @transform_2(%arg0: i32, %arg1: i32, %arg2: i32, %arg3: i32) -> (i32, i32) {
    %c0_i32 = arith.constant 0 : i32
    %c0_i32_0 = arith.constant 0 : i32
    return %c0_i32, %arg2 : i32, i32
  }
  func.func @transform_3(%arg0: i32, %arg1: i32, %arg2: i32, %arg3: i32) -> (i32, i32, i32) {
    %c0_i32 = arith.constant 0 : i32
    return %arg0, %arg1, %arg2 : i32, i32, i32
  }
  func.func @transform_4(%arg0: i32, %arg1: i32, %arg2: i32, %arg3: i32) -> (i32, i32, i32) {
    %c0_i32 = arith.constant 0 : i32
    return %arg0, %arg1, %arg2 : i32, i32, i32
  }
  func.func @transform_5(%arg0: i32, %arg1: i32, %arg2: i32, %arg3: i32) -> (i32, i32, i32) {
    %c0_i32 = arith.constant 0 : i32
    return %arg0, %arg1, %arg2 : i32, i32, i32
  }
}

</mosaic_0001>

<bundles_post_ra>
// kernel: _grouped_matmul.1
= control target key start
LH: loop header
LB: loop body
LE: loop exit
PB: predicated region body
PF: predicated region fallthrough
CT: control target
= control target key end

     0   :  { %11 = vsyncpa [#allocation3], 0  ;;  %s1289_s0 = inlined_call_operand.vmem [shape: bf16[3,16,256], index: 0, kind: input, shape index: {}]   ;;  %s1290_s1 = inlined_call_operand.vmem [shape: bf16[256,128], index: 1, kind: input, shape index: {}]   ;;  %s1291_s2 = inlined_call_operand.vmem [shape: f32[1,128], index: 2, kind: input, shape index: {}]   ;;  %s1292_s3 = inlined_call_operand.hbm [shape: f32[3,16,128], index: 3, kind: output, shape index: {0}]   ;;  %s1293_s4 = inlined_call_operand.vmem [shape: f32[3,8,128], index: 4, kind: output, shape index: {1}]   ;;  %s1294_s5 = inlined_call_operand.vmem [shape: f32[3,8,128], index: 5, kind: output, shape index: {2}]  }
   0x1   :  { %13 = vsyncpa [#allocation3 + $0x1], 0  ;;  %s1113_s18 = smov 0   ;;  %s1115_s19 = smov 0  }
   0x2   :  { %s1117_s20 = smov 0   ;;  %s1119_s21 = smov 0  }
   0x3   :  { %s1121_s22 = smov 0   ;;  %s1123_s23 = smov 0  }
   0x4 LB: > { %s863_s24 = sadd.s32 4294967295, %s1078_s23   ;;  %s864_s25 = sadd.s32 4294967294, %s1078_s23   ;;  %s1078_s23 = sphi %s1123_s23, %s19_s23   ;;  %s1074_s22 = sphi %s1121_s22, %s1301_s22   ;;  %s1070_s21 = sphi %s1119_s21, %s1300_s21   ;;  %s1066_s20 = sphi %s1117_s20, %s1299_s20   ;;  %s1062_s19 = sphi %s1115_s19, %s1298_s19   ;;  %s1058_s18 = sphi %s1113_s18, %s1297_s18  }
   0x5   : > { %s45_s26 = sadd.s32 1, %s1074_s22  ;;  %s140_s27 = sadd.s32 1, %s1066_s20 }
   0x6   : > { %p47_p0 = scmp.ge.s32.totalorder %s45_s26, 3  ;;  %p150_p1 = scmp.ne.s32.totalorder %s1066_s20, %s1062_s19 }
   0x7   : > { %p151_p2 = scmp.eq.s32.totalorder %s863_s24, 2  ;;  %p156_p3 = scmp.ne.s32.totalorder %s1062_s19, %s1058_s18 }
   0x8   : > { %s1303_s26 = smov (%p47_p0, %s45_s26), 0  ;;  %p157_p5 = scmp.eq.s32.totalorder %s864_s25, 2 }
   0x9   : > { %p1153_p4 = por %p151_p2, %p150_p1  ;;  %s133_s29 = ssub.s32 %s1074_s22, %s1303_s26 }
   0xa   : > { %p869_p6 = scmp.ge.s32.totalorder %s1078_s23, 1  ;;  %p138_p7 = scmp.eq.s32.totalorder %s133_s29, 0 }
   0xb   : > { %p1160_p8 = por %p157_p5, %p156_p3  ;;  %p272_p9 = scmp.lt.s32.totalorder %s1078_s23, 4 }
   0xc   : > { %s1166_s6 = scalar_select %p138_p7, %s1066_s20, %s140_s27  }
   0xd   : > { %p273_p10 = pnand %p869_p6, %p272_p9 }
   0xe   : > { %v981_v0 = vld [vmem:[%s1290_s1 + $0x40] sm:$0xff] (!%p273_p10)   ;;  %v983_v2 = vld [vmem:[%s1290_s1 + $0x48] sm:$0xff] (!%p273_p10)   ;;  %p342_p11 = scmp.lt.s32.totalorder (!%p273_p10), %s1070_s21, 2  ;;  %v985_v4 = vld [vmem:[%s1290_s1 + $0x50] sm:$0xff] (!%p273_p10)   ;;  %s313_s16 = sand.u32 (!%p273_p10), 1, %s1062_s19  }
   0xf   : > { %276 = sbr.rel (%p273_p10) target bundleno = 293 (0x125), region = 32  ;;  %v982_v1 = vld [vmem:[%s1290_s1] sm:$0xff] (!%p273_p10)   ;;  %901 = vmatprep.subr.bf16.mxu0 (!%p273_p10), %v981_v0  ;;  %v984_v3 = vld [vmem:[%s1290_s1 + $0x8] sm:$0xff] (!%p273_p10)   ;;  %v986_v5 = vld [vmem:[%s1290_s1 + $0x10] sm:$0xff] (!%p273_p10)   ;;  %s870_s17 = sshll.u32 (!%p273_p10), %s313_s16, 4 }
  0x10   : > { %902 = vmatpush3.bf16.msra.mxu0 (!%p273_p10), %v982_v1  ;;  %v987_v6 = vld [vmem:[%s1290_s1 + $0x58] sm:$0xff] (!%p273_p10)   ;;  %v989_v8 = vld [vmem:[%s1290_s1 + $0x60] sm:$0xff] (!%p273_p10)   ;;  %v991_v10 = vld [vmem:[%s1290_s1 + $0x68] sm:$0xff] (!%p273_p10)   ;;  %s900_s29 = sshll.u32 (!%p273_p10), %s1070_s21, 8  ;;  %s315_s7 = scalar_lea.vmem (!%p273_p10), [#allocation2], %s870_s17 }
  0x11   : > { %903 = vmatprep.subr.bf16.mxu0 (!%p273_p10), %v983_v2  ;;  %v988_v7 = vld [vmem:[%s1290_s1 + $0x18] sm:$0xff] (!%p273_p10)   ;;  %v990_v9 = vld [vmem:[%s1290_s1 + $0x20] sm:$0xff] (!%p273_p10)   ;;  %v992_v12 = vld [vmem:[%s1290_s1 + $0x28] sm:$0xff] (!%p273_p10)   ;;  %s659_s8 = sshll.u32 (!%p273_p10), %s315_s7, 4  ;;  %s1232_s10 = scalar_lea.hbm (!%p273_p10), %s1292_s3, %s900_s29  ;;  %s1234_s8 = int_to_ptr.vmem [resolvable:$true] %s659_s8 }
  0x12   : > { %v993_v13 = vld [vmem:[%s1290_s1 + $0x70] sm:$0xff] (!%p273_p10)   ;;  %v995_v15 = vld [vmem:[%s1290_s1 + $0x78] sm:$0xff] (!%p273_p10)   ;;  %v893_v23 = vld [vmem:[%s1291_s2] ss:$0 sm:$0xff] (!%p273_p10)  ;;  %s1000_s11 = scalar_lea.vmem (!%p273_p10), %s1234_s8, 256  ;;  %s1080_s12 = smov (!%p273_p10), [#allocation2]  }
  0x13   : > { %v994_v14 = vld [vmem:[%s1290_s1 + $0x30] sm:$0xff] (!%p273_p10)   ;;  %v996_v16 = vld [vmem:[%s1290_s1 + $0x38] sm:$0xff] (!%p273_p10)   ;;  %p1001_p12 = scmp.ne.s32.totalorder (!%p273_p10), %s1234_s8, %s1000_s11  ;;  %s1004_s13 = sshll.u32 (!%p273_p10), %s1080_s12, 4  ;;  %s1005_s13 = int_to_ptr.vmem [resolvable:$false] %s1004_s13 }
  0x14   : > { %904 = vmatpush3.bf16.msra.mxu0 (!%p273_p10), %v984_v3  ;;  %s1006_s15 = scalar_lea.vmem (!%p273_p10), %s1005_s13, 512  ;;  %p1007_p1 = scmp.lt.s32.totalorder (!%p273_p10), %s1234_s8, %s1005_s13 }
  0x15   : > { %905 = vmatprep.subr.bf16.mxu0 (!%p273_p10), %v985_v4  ;;  %p1002_p13 = pnand (!%p273_p10), %p1001_p12, %p1153_p4  ;;  %p1008_p2 = scmp.lt.s32.totalorder (!%p273_p10), %s1006_s15, %s1000_s11 }
  0x16   : > { %s1188_s25 = scalar_select %p342_p11, %s1070_s21, 2 }
  0x17   : > { %s1236_s21 = scalar_lea.sflag [#allocation3], %s313_s16  ;;  %p1003_p0 = pneg %p1002_p13 }
  0x18   : > { %906 = vmatpush3.bf16.msra.mxu0 %v986_v5  ;;  %s899_s9 = sshll.u32 %s1188_s25, 4  ;;  %p1009_p3 = por %p1008_p2, %p1007_p1 }
  0x19   : > { %907 = vmatprep.subr.bf16.mxu0 %v987_v6  ;;  %s353_s14 = scalar_lea.vmem %s1289_s0, %s899_s9 }
  0x1a   : > { %v999_v11 = vld [vmem:[%s353_s14 + $0x4] ss:$8 sps:$4 sm:$0xff]   ;;  %v997_v17 = vld [vmem:[%s353_s14] ss:$8 sps:$4 sm:$0xff]   ;;  %p1010_p5 = pnand %p1009_p3, %p1003_p0 }
  0x1b   : > { %570 = vmatprep.mubr.bf16.mxu0 %v999_v11 }
  0x1c   : > { %908 = vmatpush3.bf16.msra.mxu0 %v988_v7 }
  0x1d   : > { %909 = vmatprep.subr.bf16.mxu0 %v989_v8 }
  0x20   : > { %910 = vmatpush3.bf16.msra.mxu0 %v990_v9 }
  0x21   : > { %911 = vmatprep.subr.bf16.mxu0 %v991_v10 }
  0x24   : > { %912 = vmatpush3.bf16.msra.mxu0 %v992_v12 }
  0x25   : > { %913 = vmatprep.subr.bf16.mxu0 %v993_v13 }
  0x28   : > { %914 = vmatpush3.bf16.msra.mxu0 %v994_v14 }
  0x29   : > { %915 = vmatprep.subr.bf16.mxu0 %v995_v15 }
  0x2c   : > { %916 = vmatpush3.bf16.msra.mxu0 %v996_v16 }
  0x2f   : > { %571 = vmatmul.mubr.bf16.vlgmr.msra.gmra.mrb[0].mxu0 %v997_v17 }
 0x102   : > { %v917_v18 = vpop.f32.mrb[0].mxu0 }
 0x103   : > { %v918_v19 = vpop.f32.mrb[1].mxu0 }
 0x104   : > { %v919_v20 = vadd.f32 %v918_v19, %v917_v18  ;;  %v920_v21 = vpop.f32.mrb[2].mxu0 }
 0x105   : > { %v921_v22 = vpop.f32.mrb[3].mxu0 }
 0x106   : > { %v922_v24 = vadd.f32 %v921_v22, %v920_v21  ;;  %v618_v25 = vadd.f32 %v919_v20, %v893_v23  ;;  %v595_v27 = vmul.f32 %v919_v20, %v919_v20 }
 0x108   : > { %v588_v26 = vadd.f32 %v922_v24, %v919_v20  ;;  %v596_v28 = vmul.f32 %v922_v24, %v922_v24  ;;  %v619_v29 = vadd.f32 %v922_v24, %v893_v23  ;;  %620 = vst [vmem:[%s315_s7] sm:$0xff] %v618_v25 }
 0x10a   : > { %v589_v30 = vrot.slane %v588_v26, 4  ;;  %v597_v31 = vadd.f32 %v596_v28, %v595_v27  ;;  %621 = vst [vmem:[%s315_s7 + $0x8] sm:$0xff] %v619_v29 }
 0x10b   : > { %1013 = shalt.err (!%p1010_p5)
}
 0x10c   : > { %s1014_s16 = scalar_lea.hbm %s1232_s10, 256  ;;  %s1018_s27 = scalar_lea.hbm %s1292_s3, 768 }
 0x10d   : > { %p1015_p6 = scmp.ne.s32.totalorder %s1232_s10, %s1014_s16  ;;  %p1019_p10 = scmp.lt.u32.totalorder %s1232_s10, %s1292_s3 }
 0x10e   : > { %p1020_p11 = scmp.lt.u32.totalorder %s1018_s27, %s1014_s16  ;;  %p1022_p13 = scmp.lt.u32.totalorder %s1014_s16, %s1232_s10 }
 0x10f   : > { %p1016_p7 = pnand %p1015_p6, %p1153_p4 }
 0x110   : > { %p1021_p12 = por %p1020_p11, %p1019_p10 }
 0x111   : > { %p1017_p9 = pneg %p1016_p7 }
 0x112   : > { %p1023_p0 = por %p1022_p13, %p1021_p12 }
 0x114   : > { %p1024_p1 = pnand %p1023_p0, %p1017_p9 }
 0x116   : > { %1027 = shalt.err (!%p1024_p1)
}
 0x117   : > { %s1081_s14 = smov 128   ;;  %s1082_s9 = smov 8   ;;  %v590_v32 = vadd.f32 %v589_v30, %v588_v26  ;;  %v598_v33 = vrot.slane %v597_v31, 4  ;;  %vm604_vm0 = vcmask 1040384  }
 0x118   : > { %923 = dma.vmem_to_hbm [thread:$0]  (%p1153_p4), %s1234_s8, 256, %s1232_s10, %s1236_s21, %s1081_s14, %s1081_s14, %s1082_s9  }
 0x119   : > { %v591_v34 = vrot.slane %v590_v32, 2  ;;  %v599_v35 = vadd.f32 %v598_v33, %v597_v31  ;;  %s873_s11 = sshll.u32 %s1188_s25, 3 }
 0x11a   : > { %s378_s15 = scalar_lea.vmem %s1293_s4, %s873_s11  ;;  %s388_s28 = scalar_lea.vmem %s1294_s5, %s873_s11 }
 0x11b   : > { %v592_v36 = vadd.f32 %v591_v34, %v590_v32  ;;  %v600_v37 = vrot.slane %v599_v35, 2 }
 0x11d   : > { %v593_v38 = vrot.slane %v592_v36, 1  ;;  %v601_v39 = vadd.f32 %v600_v37, %v599_v35 }
 0x11f   : > { %v594_v40 = vadd.f32 %v593_v38, %v592_v36  ;;  %v602_v41 = vrot.slane %v601_v39, 1 }
 0x121   : > { %v603_v42 = vadd.f32 %v602_v41, %v601_v39  ;;  %v605_v43 = vsel %vm604_vm0, %v594_v40, 0.0 }
 0x122   : > { %606 = vst [vmem:[%s378_s15] sm:$0xff] %v605_v43 }
 0x123   : > { %v607_v44 = vsel %vm604_vm0, %v603_v42, 0.0 }
 0x124   : > { %608 = vst [vmem:[%s388_s28] sm:$0xff] %v607_v44 }
 0x125 PF: > { %p929_p4 = scmp.ge.s32.totalorder %s1078_s23, 2  ;;  %s680_s25 = sand.u32 1, %s1058_s18  }
 0x126   : > { %s681_s8 = scalar_lea.sflag [#allocation3], %s680_s25 }
 0x127   : > { %p926_p2 = pnand %p929_p4, %p1160_p8 }
 0x129   : > { %1053 = dma.done.wait (!%p926_p2), %s681_s8, 256  }
 0x12a   : > { %1055 = vsyncadd (!%p926_p2), %s681_s8, 4294967040  ;;  %s19_s23 = sadd.s32 1, %s1078_s23   ;;  %s1297_s18 = smov %s1062_s19 }
 0x12b   : > { %p16_p3 = scmp.ge.s32.totalorder %s19_s23, 5   ;;  %s1298_s19 = smov %s1066_s20 }
 0x12c   : > { %s1299_s20 = smov %s1166_s6  ;;  %s1300_s21 = smov %s1074_s22 }
 0x12d   : > { %s1301_s22 = smov %s1303_s26  ;;  %18 = sbr.rel (!%p16_p3) target bundleno = 4 (0x4), region = 105 }
 0x134   :  { %712 = vsyncpa [#allocation3], 1 }
 0x135   :  { %714 = vsyncpa [#allocation3 + $0x1], 1 }

</bundles_post_ra>
